<compile_context>
chip_gen: v5e
topology: v5e:2x2
jax: 0.10.0
libtpu: 0.0.40
codegen_flags: <defaults>
</compile_context>

<pallas_src>
import jax
import jax.numpy as jnp
from jax.experimental import pallas as pl
from jax.experimental.pallas import tpu as pltpu


def _sum_reduce_kernel(x_ref, o_ref, acc_ref):
    # x_ref: (TI, TK) input tile; o_ref: (1, TK) output tile; acc_ref: (1, TK) f32.
    it = pl.program_id(2)

    @pl.when(it == 0)
    def _():
        acc_ref[...] = jnp.zeros_like(acc_ref)

    # Per-step partial reduction over the sublane (I) axis of this tile.
    acc_ref[...] += jnp.sum(x_ref[...].astype(jnp.float32), axis=0, keepdims=True)

    @pl.when(it == pl.num_programs(2) - 1)
    def _():
        o_ref[...] = acc_ref[...].astype(o_ref.dtype)


def _pick_tile(full: int, max_tile: int, align: int) -> int:
    """Largest tile <= max_tile that is a multiple of `align` and divides `full`,
    or the full extent if the dim already fits / no aligned divisor exists."""
    if full <= max_tile:
        return full
    t = (max_tile // align) * align
    while t >= align:
        if full % t == 0:
            return t
        t -= align
    return full  # fallback: full extent (always legal block shape)


def sum_reduce_dim1(x: jax.Array, *, max_ti: int = 1024, max_tk: int = 512) -> jax.Array:
    """Sum over dim=1 of a (B, I, K) array, producing (B, 1, K)."""
    B, I, K = x.shape
    TI = _pick_tile(I, max_ti, 8)     # sublane axis: multiple of 8 (or full I)
    TK = _pick_tile(K, max_tk, 128)   # lane axis: multiple of 128 (or full K)
    grid = (B, K // TK, I // TI)

    itemsize = jnp.dtype(x.dtype).itemsize
    cost = pl.CostEstimate(
        flops=B * I * K,
        transcendentals=0,
        bytes_accessed=itemsize * B * I * K + itemsize * B * K,
    )

    return pl.pallas_call(
        _sum_reduce_kernel,
        out_shape=jax.ShapeDtypeStruct((B, 1, K), x.dtype),
        grid_spec=pltpu.PrefetchScalarGridSpec(
            num_scalar_prefetch=0,
            grid=grid,
            in_specs=[
                # (batch squeezed, TI, TK); index_map returns (batch, I-block, K-block)
                pl.BlockSpec((None, TI, TK), lambda b, kt, it: (b, it, kt)),
            ],
            out_specs=pl.BlockSpec((None, 1, TK), lambda b, kt, it: (b, 0, kt)),
            scratch_shapes=[pltpu.VMEM((1, TK), jnp.float32)],
        ),
        compiler_params=pltpu.CompilerParams(
            dimension_semantics=("parallel", "parallel", "arbitrary"),
        ),
        cost_estimate=cost,
    )(x)


if __name__ == "__main__":
    key = jax.random.PRNGKey(0)

    # Spec shape from the PyTorch module: (16, 256, 256) float32 -> (16, 1, 256).
    B, I, K = 16, 256, 256
    x = jax.random.normal(key, (B, I, K), dtype=jnp.float32)
    out = jax.block_until_ready(sum_reduce_dim1(x))
    ref = jnp.sum(x, axis=1, keepdims=True)
    assert out.shape == (B, 1, K), out.shape
    assert out.dtype == jnp.float32
    assert jnp.allclose(out, ref, atol=1e-4, rtol=1e-5)

    # Second case exercising the tiled-I accumulator path (grid I-axis > 1).
    B2, I2, K2 = 2, 2048, 384
    x2 = jax.random.normal(jax.random.PRNGKey(1), (B2, I2, K2), dtype=jnp.float32)
    out2 = jax.block_until_ready(sum_reduce_dim1(x2))
    ref2 = jnp.sum(x2, axis=1, keepdims=True)
    assert out2.shape == (B2, 1, K2)
    assert jnp.allclose(out2, ref2, atol=1e-3, rtol=1e-5)

    print("KERNEL_OK")
</pallas_src>

<mosaic_0001>
module attributes {stable_mosaic.version = 11 : i64} {
  func.func @_sum_reduce_kernel(%arg0: i32, %arg1: i32, %arg2: i32, %arg3: memref<1x256x256xf32, #tpu.memory_space<vmem>>, %arg4: memref<1x1x256xf32, #tpu.memory_space<vmem>>, %arg5: memref<1x256xf32, #tpu.memory_space<vmem>>) attributes {dimension_semantics = [#tpu.dimension_semantics<parallel>, #tpu.dimension_semantics<parallel>, #tpu.dimension_semantics<arbitrary>], iteration_bounds = array<i64: 16, 1, 1>, scalar_prefetch = 0 : i64, scratch_operands = 1 : i64, tpu.core_type = #tpu.core_type<tc>, window_params = [{transform_indices = @transform_0, window_bounds = array<i64: 1, 256, 256>}, {transform_indices = @transform_1, window_bounds = array<i64: 1, 1, 256>}]} {
    %c0_i32 = arith.constant 0 : i32
    %0 = arith.cmpi eq, %arg2, %c0_i32 : i32
    %1 = arith.extui %0 : i1 to i32
    %c0_i32_0 = arith.constant 0 : i32
    %2 = arith.cmpi ne, %1, %c0_i32_0 : i32
    scf.if %2 {
      %cst_9 = arith.constant 0.000000e+00 : f32
      %13 = vector.broadcast %cst_9 : f32 to vector<1x256xf32>
      %c0_10 = arith.constant 0 : index
      %c0_11 = arith.constant 0 : index
      %14 = vector.load %arg5[%c0_10, %c0_11] : memref<1x256xf32, #tpu.memory_space<vmem>>, vector<1x256xf32>
      tpu.vector_store %arg5[%c0_10, %c0_11], %13 {strides = array<i32>} : memref<1x256xf32, #tpu.memory_space<vmem>>, vector<1x256xf32>,
    } else {
    }
    %c0 = arith.constant 0 : index
    %c0_1 = arith.constant 0 : index
    %3 = vector.load %arg5[%c0, %c0_1] : memref<1x256xf32, #tpu.memory_space<vmem>>, vector<1x256xf32>
    %c0_2 = arith.constant 0 : index
    %c0_3 = arith.constant 0 : index
    %c0_4 = arith.constant 0 : index
    %4 = vector.load %arg3[%c0_2, %c0_3, %c0_4] : memref<1x256x256xf32, #tpu.memory_space<vmem>>, vector<1x256x256xf32>
    %5 = vector.shape_cast %4 : vector<1x256x256xf32> to vector<256x256xf32>
    %cst = arith.constant dense<0.000000e+00> : vector<256xf32>
    %6 = vector.multi_reduction <add>, %5, %cst [0] : vector<256x256xf32> to vector<256xf32>
    %7 = vector.shape_cast %6 : vector<256xf32> to vector<1x256xf32>
    %8 = arith.addf %3, %7 : vector<1x256xf32>
    %c0_5 = arith.constant 0 : index
    %c0_6 = arith.constant 0 : index
    %9 = vector.load %arg5[%c0_5, %c0_6] : memref<1x256xf32, #tpu.memory_space<vmem>>, vector<1x256xf32>
    tpu.vector_store %arg5[%c0_5, %c0_6], %8 {strides = array<i32>} : memref<1x256xf32, #tpu.memory_space<vmem>>, vector<1x256xf32>,
    %c0_i32_7 = arith.constant 0 : i32
    %10 = arith.cmpi eq, %arg2, %c0_i32_7 : i32
    %11 = arith.extui %10 : i1 to i32
    %c0_i32_8 = arith.constant 0 : i32
    %12 = arith.cmpi ne, %11, %c0_i32_8 : i32
    scf.if %12 {
      %c0_9 = arith.constant 0 : index
      %c0_10 = arith.constant 0 : index
      %13 = vector.load %arg5[%c0_9, %c0_10] : memref<1x256xf32, #tpu.memory_space<vmem>>, vector<1x256xf32>
      %c0_11 = arith.constant 0 : index
      %c0_12 = arith.constant 0 : index
      %c0_13 = arith.constant 0 : index
      %14 = vector.load %arg4[%c0_11, %c0_12, %c0_13] : memref<1x1x256xf32, #tpu.memory_space<vmem>>, vector<1x1x256xf32>
      %15 = vector.shape_cast %14 : vector<1x1x256xf32> to vector<1x256xf32>
      %16 = vector.shape_cast %13 : vector<1x256xf32> to vector<1x1x256xf32>
      tpu.vector_store %arg4[%c0_11, %c0_12, %c0_13], %16 {strides = array<i32>} : memref<1x1x256xf32, #tpu.memory_space<vmem>>, vector<1x1x256xf32>,
    } else {
    }
    return
  }
  func.func @transform_0(%arg0: i32, %arg1: i32, %arg2: i32) -> (i32, i32, i32) {
    %c0_i32 = arith.constant 0 : i32
    return %arg0, %arg2, %arg1 : i32, i32, i32
  }
  func.func @transform_1(%arg0: i32, %arg1: i32, %arg2: i32) -> (i32, i32, i32) {
    %c0_i32 = arith.constant 0 : i32
    %c0_i32_0 = arith.constant 0 : i32
    return %arg0, %c0_i32, %arg1 : i32, i32, i32
  }
}

</mosaic_0001>

<bundles_post_ra>
// kernel: tpu_custom_call.1
= control target key start
LH: loop header
LB: loop body
LE: loop exit
PB: predicated region body
PF: predicated region fallthrough
CT: control target
= control target key end

     0   :  { %6 = vsyncpa [#allocation4], 0  ;;  %s843_s0 = inlined_call_operand.hbm [shape: f32[16,256,256], index: 0, kind: input, shape index: {}]   ;;  %s844_s1 = inlined_call_operand.hbm [shape: f32[16,1,256], index: 1, kind: output, shape index: {}]  }
   0x1   :  { %8 = vsyncpa [#allocation4 + $0x1], 0 }
   0x2   :  { %9 = vsyncpa [#allocation5], 0 }
   0x3   :  { %11 = vsyncpa [#allocation5 + $0x1], 0  ;;  %s648_s6 = smov 0   ;;  %s650_s7 = smov 0  }
   0x4   :  { %s652_s8 = smov 0   ;;  %s654_s9 = smov 0  }
   0x5   :  { %s656_s10 = smov 0   ;;  %s658_s11 = smov 0  }
   0x6 LB: > { %s441_s12 = sadd.s32 4294967295, %s633_s11   ;;  %s442_s13 = sadd.s32 4294967294, %s633_s11   ;;  %s633_s11 = sphi %s658_s11, %s17_s11   ;;  %s629_s10 = sphi %s656_s10, %s855_s10   ;;  %s625_s9 = sphi %s654_s9, %s854_s9   ;;  %s621_s8 = sphi %s652_s8, %s853_s8   ;;  %s617_s7 = sphi %s650_s7, %s852_s7   ;;  %s613_s6 = sphi %s648_s6, %s851_s6  }
   0x7   : > { %s36_s14 = sadd.s32 1, %s629_s10  ;;  %s47_s15 = sadd.s32 1, %s621_s8 }
   0x8   : > { %p38_p0 = scmp.ge.s32.totalorder %s36_s14, 16  ;;  %p54_p1 = scmp.ne.s32.totalorder %s621_s8, %s617_s7 }
   0x9   : > { %p55_p2 = scmp.eq.s32.totalorder %s633_s11, 0  ;;  %p60_p3 = scmp.ne.s32.totalorder %s617_s7, %s613_s6 }
   0xa   : > { %s857_s14 = smov (%p38_p0, %s36_s14), 0  ;;  %p61_p5 = scmp.eq.s32.totalorder %s441_s12, 0 }
   0xb   : > { %p689_p4 = por %p55_p2, %p54_p1  ;;  %s40_s17 = ssub.s32 %s629_s10, %s857_s14 }
   0xc   : > { %p86_p6 = scmp.eq.s32.totalorder %s441_s12, 15  ;;  %p45_p7 = scmp.eq.s32.totalorder %s40_s17, 0 }
   0xd   : > { %p695_p8 = por %p61_p5, %p60_p3  ;;  %p92_p10 = scmp.eq.s32.totalorder %s442_s13, 15 }
   0xe   : > { %p699_p9 = por %p86_p6, %p54_p1  ;;  %p468_p12 = scmp.lt.s32.totalorder %s633_s11, 16 }
   0xf   : > { %s704_s20 = scalar_select %p45_p7, %s621_s8, %s47_s15  }
  0x10   : > { %p706_p11 = por %p92_p10, %p60_p3  ;;  %s112_s22 = sand.u32 1, %s621_s8  }
  0x11   : > { %s445_s23 = sshll.u32 %s112_s22, 9  ;;  %s455_s24 = sshll.u32 %s629_s10, 9 }
  0x12   : > { %s126_s27 = scalar_lea.hbm %s843_s0, %s455_s24  ;;  %s116_s28 = scalar_lea.vmem [#allocation3], %s445_s23 }
  0x13   : > { %s129_s29 = sshll.u32 %s116_s28, 4  ;;  %s127_s30 = sshll.u32 %s126_s27, 4  ;;  %s130_s29 = int_to_ptr.vmem [resolvable:$true] %s129_s29  ;;  %s128_s30 = int_to_ptr.hbm [resolvable:$true] %s127_s30 }
  0x14   : > { %p461_p13 = pnand %p468_p12, %p689_p4  ;;  %p448_p0 = scmp.ge.s32.totalorder %s633_s11, 1 }
  0x15   : > { %s113_s2 = scalar_lea.sflag [#allocation4], %s112_s22  ;;  %s635_s3 = smov 256  }
  0x16   : > { %s636_s4 = smov 16   ;;  %p137_p1 = scmp.lt.s32.totalorder %s633_s11, 17 }
  0x17   : > { %463 = dma.hbm_to_vmem [thread:$0]  (!%p461_p13), %s128_s30, 8192, %s130_s29, %s113_s2, %s635_s3, %s635_s3, %s636_s4  }
  0x18   : > { %p138_p2 = pnand %p448_p0, %p137_p1 }
  0x19   : > { %s721_s5 = sand.u32 (!%p138_p2), 1, %s617_s7  }
  0x1a   : > { %141 = sbr.rel (%p138_p2) target bundleno = 124 (0x7c), region = 24  ;;  %s449_s12 = sshll.u32 (!%p138_p2), %s721_s5, 9 }
  0x1b   : > { %s144_s13 = scalar_lea.sflag (!%p138_p2), [#allocation4], %s721_s5  ;;  %s725_s15 = scalar_lea.vmem (!%p138_p2), [#allocation3], %s449_s12 }
  0x1f   : > { %604 = dma.done.wait (%p695_p8), %s144_s13, 8192  }
  0x20   : > { %606 = vsyncadd (%p695_p8), %s144_s13, 4294959104  ;;  %v174_v0 = vlaneseq  ;;  %v637_v2 = vmov 0.0   ;;  %v180_v3 = vld [vmem:[%s725_s15] sm:$0xff]  ;;  %v181_v4 = vld [vmem:[%s725_s15 + $0x8] sm:$0xff]  ;;  %vm321_vm1 = vcmask 1040384   ;;  %s450_s16 = sshll.u32 %s721_s5, 1 }
  0x21   : > { %v182_v5 = vld [vmem:[%s725_s15 + $0x10] sm:$0xff]  ;;  %v183_v6 = vld [vmem:[%s725_s15 + $0x18] sm:$0xff]  ;;  %v184_v7 = vld [vmem:[%s725_s15 + $0x20] sm:$0xff]  ;;  %s452_s17 = sshll.u32 %s625_s9, 1  ;;  %s166_s24 = scalar_lea.vmem [#allocation6], %s450_s16 }
  0x22   : > { %vm731_vm0 = vcmp.lt.s32.totalorder %v174_v0, 256  ;;  %v185_v8 = vld [vmem:[%s725_s15 + $0x28] sm:$0xff]  ;;  %v244_v9 = vadd.f32 %v182_v5, %v180_v3  ;;  %v186_v10 = vld [vmem:[%s725_s15 + $0x30] sm:$0xff]  ;;  %v281_v11 = vadd.f32 %v183_v6, %v181_v4  ;;  %v187_v12 = vld [vmem:[%s725_s15 + $0x38] sm:$0xff]  ;;  %s348_s23 = scalar_lea.hbm %s844_s1, %s452_s17  ;;  %s350_s25 = sshll.u32 %s166_s24, 4  ;;  %s351_s25 = int_to_ptr.vmem [resolvable:$true] %s350_s25 }
  0x23   : > { %178 = vst.msk [vmem:[#allocation2] sm:$0x3] %vm731_vm0, %v637_v2  ;;  %v188_v14 = vld [vmem:[%s725_s15 + $0x40] sm:$0xff]  ;;  %v189_v16 = vld [vmem:[%s725_s15 + $0x48] sm:$0xff]  ;;  %v190_v18 = vld [vmem:[%s725_s15 + $0x50] sm:$0xff]  ;;  %s352_s26 = sshll.u32 %s348_s23, 4  ;;  %s353_s26 = int_to_ptr.hbm [resolvable:$true] %s352_s26 }
  0x24   : > { %v245_v13 = vadd.f32 %v244_v9, %v184_v7  ;;  %v282_v15 = vadd.f32 %v281_v11, %v185_v8  ;;  %v191_v20 = vld [vmem:[%s725_s15 + $0x58] sm:$0xff]  ;;  %v192_v22 = vld [vmem:[%s725_s15 + $0x60] sm:$0xff]  ;;  %v193_v24 = vld [vmem:[%s725_s15 + $0x68] sm:$0xff]  ;;  %s336_s27 = scalar_lea.sflag [#allocation5], %s721_s5  ;;  %s565_s9 = sshra.s32 %s353_s26, 4  ;;  %s566_s9 = int_to_ptr.hbm [resolvable:$true] %s565_s9 }
  0x25   : > { %v194_v26 = vld [vmem:[%s725_s15 + $0x70] sm:$0xff]  ;;  %v195_v28 = vld [vmem:[%s725_s15 + $0x78] sm:$0xff]  ;;  %v196_v30 = vld [vmem:[%s725_s15 + $0x80] sm:$0xff]  ;;  %s567_s28 = scalar_lea.hbm %s566_s9, 2  ;;  %s571_s2 = scalar_lea.hbm %s844_s1, 32 }
  0x26   : > { %v246_v17 = vadd.f32 %v245_v13, %v186_v10  ;;  %v283_v19 = vadd.f32 %v282_v15, %v187_v12  ;;  %v197_v32 = vld [vmem:[%s725_s15 + $0x88] sm:$0xff]  ;;  %v198_v34 = vld [vmem:[%s725_s15 + $0x90] sm:$0xff]  ;;  %v199_v36 = vld [vmem:[%s725_s15 + $0x98] sm:$0xff]  ;;  %p568_p3 = scmp.ne.s32.totalorder %s566_s9, %s567_s28  ;;  %p572_p6 = scmp.lt.s32.totalorder %s566_s9, %s844_s1 }
  0x27   : > { %v200_v38 = vld [vmem:[%s725_s15 + $0xa0] sm:$0xff]  ;;  %v201_v40 = vld [vmem:[%s725_s15 + $0xa8] sm:$0xff]  ;;  %v202_v42 = vld [vmem:[%s725_s15 + $0xb0] sm:$0xff]  ;;  %p573_p7 = scmp.lt.s32.totalorder %s571_s2, %s567_s28 }
  0x28   : > { %v247_v21 = vadd.f32 %v246_v17, %v188_v14  ;;  %v284_v23 = vadd.f32 %v283_v19, %v189_v16  ;;  %v203_v44 = vld [vmem:[%s725_s15 + $0xb8] sm:$0xff]  ;;  %v204_v46 = vld [vmem:[%s725_s15 + $0xc0] sm:$0xff]  ;;  %v205_v48 = vld [vmem:[%s725_s15 + $0xc8] sm:$0xff]  ;;  %p569_p4 = pnand %p568_p3, %p699_p9 }
  0x29   : > { %v206_v50 = vld [vmem:[%s725_s15 + $0xd0] sm:$0xff]  ;;  %v207_v52 = vld [vmem:[%s725_s15 + $0xd8] sm:$0xff]  ;;  %v208_v54 = vld [vmem:[%s725_s15 + $0xe0] sm:$0xff]  ;;  %p574_p8 = por %p573_p7, %p572_p6 }
  0x2a   : > { %v248_v25 = vadd.f32 %v247_v21, %v190_v18  ;;  %v285_v27 = vadd.f32 %v284_v23, %v191_v20  ;;  %v209_v56 = vld [vmem:[%s725_s15 + $0xe8] sm:$0xff]  ;;  %v210_v58 = vld [vmem:[%s725_s15 + $0xf0] sm:$0xff]  ;;  %v211_v60 = vld [vmem:[%s725_s15 + $0xf8] sm:$0xff]  ;;  %p570_p5 = pneg %p569_p4 }
  0x2b   : > { %v212_v62 = vld [vmem:[%s725_s15 + $0x100] sm:$0xff]  ;;  %v213_v0 = vld [vmem:[%s725_s15 + $0x108] sm:$0xff]  ;;  %v214_v3 = vld [vmem:[%s725_s15 + $0x110] sm:$0xff] }
  0x2c   : > { %v249_v29 = vadd.f32 %v248_v25, %v192_v22  ;;  %v286_v31 = vadd.f32 %v285_v27, %v193_v24  ;;  %v215_v5 = vld [vmem:[%s725_s15 + $0x118] sm:$0xff]  ;;  %v216_v7 = vld [vmem:[%s725_s15 + $0x120] sm:$0xff]  ;;  %v217_v9 = vld [vmem:[%s725_s15 + $0x128] sm:$0xff]  ;;  %p575_p10 = pnand %p574_p8, %p570_p5 }
  0x2d   : > { %v218_v11 = vld [vmem:[%s725_s15 + $0x130] sm:$0xff]  ;;  %v219_v13 = vld [vmem:[%s725_s15 + $0x138] sm:$0xff]  ;;  %v220_v15 = vld [vmem:[%s725_s15 + $0x140] sm:$0xff] }
  0x2e   : > { %v250_v33 = vadd.f32 %v249_v29, %v194_v26  ;;  %v287_v35 = vadd.f32 %v286_v31, %v195_v28  ;;  %v221_v17 = vld [vmem:[%s725_s15 + $0x148] sm:$0xff]  ;;  %v222_v19 = vld [vmem:[%s725_s15 + $0x150] sm:$0xff]  ;;  %v223_v21 = vld [vmem:[%s725_s15 + $0x158] sm:$0xff] }
  0x2f   : > { %v224_v23 = vld [vmem:[%s725_s15 + $0x160] sm:$0xff]  ;;  %v225_v25 = vld [vmem:[%s725_s15 + $0x168] sm:$0xff]  ;;  %v226_v27 = vld [vmem:[%s725_s15 + $0x170] sm:$0xff] }
  0x30   : > { %v251_v37 = vadd.f32 %v250_v33, %v196_v30  ;;  %v288_v39 = vadd.f32 %v287_v35, %v197_v32  ;;  %v227_v29 = vld [vmem:[%s725_s15 + $0x178] sm:$0xff]  ;;  %v228_v31 = vld [vmem:[%s725_s15 + $0x180] sm:$0xff]  ;;  %v229_v33 = vld [vmem:[%s725_s15 + $0x188] sm:$0xff] }
  0x31   : > { %v230_v35 = vld [vmem:[%s725_s15 + $0x190] sm:$0xff] }
  0x32   : > { %v252_v41 = vadd.f32 %v251_v37, %v198_v34  ;;  %v289_v43 = vadd.f32 %v288_v39, %v199_v36  ;;  %v231_v37 = vld [vmem:[%s725_s15 + $0x198] sm:$0xff]  ;;  %v232_v39 = vld [vmem:[%s725_s15 + $0x1a0] sm:$0xff] }
  0x34   : > { %v253_v45 = vadd.f32 %v252_v41, %v200_v38  ;;  %v290_v47 = vadd.f32 %v289_v43, %v201_v40  ;;  %v233_v41 = vld [vmem:[%s725_s15 + $0x1a8] sm:$0xff]  ;;  %v234_v43 = vld [vmem:[%s725_s15 + $0x1b0] sm:$0xff] }
  0x36   : > { %v254_v49 = vadd.f32 %v253_v45, %v202_v42  ;;  %v291_v51 = vadd.f32 %v290_v47, %v203_v44  ;;  %v235_v45 = vld [vmem:[%s725_s15 + $0x1b8] sm:$0xff]  ;;  %v236_v47 = vld [vmem:[%s725_s15 + $0x1c0] sm:$0xff] }
  0x38   : > { %v255_v53 = vadd.f32 %v254_v49, %v204_v46  ;;  %v292_v55 = vadd.f32 %v291_v51, %v205_v48  ;;  %v237_v49 = vld [vmem:[%s725_s15 + $0x1c8] sm:$0xff]  ;;  %v238_v51 = vld [vmem:[%s725_s15 + $0x1d0] sm:$0xff] }
  0x3a   : > { %v256_v57 = vadd.f32 %v255_v53, %v206_v50  ;;  %v293_v59 = vadd.f32 %v292_v55, %v207_v52  ;;  %v239_v53 = vld [vmem:[%s725_s15 + $0x1d8] sm:$0xff]  ;;  %v240_v55 = vld [vmem:[%s725_s15 + $0x1e0] sm:$0xff] }
  0x3c   : > { %v257_v61 = vadd.f32 %v256_v57, %v208_v54  ;;  %v294_v63 = vadd.f32 %v293_v59, %v209_v56  ;;  %v241_v57 = vld [vmem:[%s725_s15 + $0x1e8] sm:$0xff]  ;;  %v242_v59 = vld [vmem:[%s725_s15 + $0x1f0] sm:$0xff] }
  0x3e   : > { %v258_v2 = vadd.f32 %v257_v61, %v210_v58  ;;  %v295_v4 = vadd.f32 %v294_v63, %v211_v60  ;;  %v243_v61 = vld [vmem:[%s725_s15 + $0x1f8] sm:$0xff] }
  0x40   : > { %v259_v6 = vadd.f32 %v258_v2, %v212_v62  ;;  %v296_v8 = vadd.f32 %v295_v4, %v213_v0 }
  0x42   : > { %v260_v10 = vadd.f32 %v259_v6, %v214_v3  ;;  %v297_v12 = vadd.f32 %v296_v8, %v215_v5 }
  0x44   : > { %v261_v14 = vadd.f32 %v260_v10, %v216_v7  ;;  %v298_v16 = vadd.f32 %v297_v12, %v217_v9 }
  0x46   : > { %v262_v18 = vadd.f32 %v261_v14, %v218_v11  ;;  %v299_v20 = vadd.f32 %v298_v16, %v219_v13 }
  0x48   : > { %v263_v22 = vadd.f32 %v262_v18, %v220_v15  ;;  %v300_v24 = vadd.f32 %v299_v20, %v221_v17  ;;  %v179_v15 = vld [vmem:[#allocation2] sm:$0x3] }
  0x4a   : > { %v264_v26 = vadd.f32 %v263_v22, %v222_v19  ;;  %v301_v28 = vadd.f32 %v300_v24, %v223_v21 }
  0x4c   : > { %v265_v30 = vadd.f32 %v264_v26, %v224_v23  ;;  %v302_v32 = vadd.f32 %v301_v28, %v225_v25 }
  0x4e   : > { %v266_v34 = vadd.f32 %v265_v30, %v226_v27  ;;  %v303_v36 = vadd.f32 %v302_v32, %v227_v29 }
  0x50   : > { %v267_v38 = vadd.f32 %v266_v34, %v228_v31  ;;  %v304_v40 = vadd.f32 %v303_v36, %v229_v33 }
  0x52   : > { %v268_v42 = vadd.f32 %v267_v38, %v230_v35  ;;  %v305_v44 = vadd.f32 %v304_v40, %v231_v37 }
  0x54   : > { %v269_v46 = vadd.f32 %v268_v42, %v232_v39  ;;  %v306_v48 = vadd.f32 %v305_v44, %v233_v41 }
  0x56   : > { %v270_v50 = vadd.f32 %v269_v46, %v234_v43  ;;  %v307_v52 = vadd.f32 %v306_v48, %v235_v45 }
  0x58   : > { %v271_v54 = vadd.f32 %v270_v50, %v236_v47  ;;  %v308_v56 = vadd.f32 %v307_v52, %v237_v49 }
  0x5a   : > { %v272_v58 = vadd.f32 %v271_v54, %v238_v51  ;;  %v309_v60 = vadd.f32 %v308_v56, %v239_v53 }
  0x5c   : > { %v273_v62 = vadd.f32 %v272_v58, %v240_v55  ;;  %v310_v63 = vadd.f32 %v309_v60, %v241_v57 }
  0x5e   : > { %v274_v0 = vadd.f32 %v273_v62, %v242_v59  ;;  %v311_v2 = vadd.f32 %v310_v63, %v243_v61 }
  0x60   : > { %v275_v3 = vrot.slane %v274_v0, 4  ;;  %v312_v4 = vrot.slane %v311_v2, 4 }
  0x62   : > { %v276_v5 = vadd.f32 %v275_v3, %v274_v0  ;;  %v313_v6 = vadd.f32 %v312_v4, %v311_v2 }
  0x64   : > { %v277_v7 = vrot.slane %v276_v5, 2  ;;  %v314_v8 = vrot.slane %v313_v6, 2 }
  0x66   : > { %v278_v9 = vadd.f32 %v277_v7, %v276_v5  ;;  %v315_v10 = vadd.f32 %v314_v8, %v313_v6 }
  0x68   : > { %v279_v11 = vrot.slane %v278_v9, 1  ;;  %v316_v12 = vrot.slane %v315_v10, 1 }
  0x6a   : > { %v280_v13 = vadd.f32 %v279_v11, %v278_v9  ;;  %v317_v14 = vadd.f32 %v316_v12, %v315_v10 }
  0x6c   : > { %v320_v16 = vrot.slane %v317_v14, 7 }
  0x6e   : > { %v322_v17 = vsel %vm321_vm1, %v280_v13, %v320_v16 }
  0x6f   : > { %v324_v18 = vadd.f32 %v322_v17, %v179_v15 }
  0x71   : > { %329 = vst.msk [vmem:[#allocation2] sm:$0x3] %vm731_vm0, %v324_v18 }
  0x78   : > { %v333_v19 = vld [vmem:[#allocation2] sm:$0x3] }
  0x79   : > { %334 = vst.msk [vmem:[%s166_s24] sm:$0x3] %vm731_vm0, %v333_v19 }
  0x7a   : > { %578 = shalt.err (!%p575_p10)
}
  0x7b   : > { %458 = dma.vmem_to_hbm [thread:$0]  (%p699_p9), %s351_s25, 32, %s353_s26, %s336_s27  }
  0x7c PF: > { %p469_p12 = scmp.ge.s32.totalorder %s633_s11, 2  ;;  %s364_s5 = sand.u32 1, %s613_s6  }
  0x7d   : > { %s365_s12 = scalar_lea.sflag [#allocation5], %s364_s5 }
  0x7e   : > { %p465_p13 = pnand %p469_p12, %p706_p11 }
  0x80   : > { %p466_p0 = pneg %p465_p13 }
  0x82   : > { %608 = dma.done.wait (%p466_p0), %s365_s12, 32  }
  0x83   : > { %610 = vsyncadd (%p466_p0), %s365_s12, 4294967264  ;;  %s17_s11 = sadd.s32 1, %s633_s11   ;;  %s851_s6 = smov %s617_s7 }
  0x84   : > { %p14_p1 = scmp.ge.s32.totalorder %s17_s11, 18   ;;  %s852_s7 = smov %s621_s8 }
  0x85   : > { %s853_s8 = smov %s704_s20  ;;  %s854_s9 = smov %s629_s10 }
  0x86   : > { %s855_s10 = smov %s857_s14  ;;  %16 = sbr.rel (!%p14_p1) target bundleno = 6 (0x6), region = 77 }
  0x8b   :  { %371 = vsyncpa [#allocation4], 1 }
  0x8c   :  { %373 = vsyncpa [#allocation4 + $0x1], 1 }
  0x8d   :  { %374 = vsyncpa [#allocation5], 1 }
  0x8e   :  { %376 = vsyncpa [#allocation5 + $0x1], 1 }

</bundles_post_ra>
